<compile_context>
chip_gen: v7x
topology: tpu7x:2x2x1
jax: 0.10.0
libtpu: 0.0.40
codegen_flags: <defaults>
</compile_context>

<pallas_src>
import functools

import jax
import jax.numpy as jnp
from jax import lax
from jax.experimental import pallas as pl
from jax.experimental.pallas import tpu as pltpu

_VMEM_LIMIT = 32 * 1024 * 1024          # explicit scoped-VMEM cap (safe on all gens)
_BLOCK_BUDGET_ELEMS = 512 * 1024        # ~2 MiB f32 per x block


def _pick_tile(extent, multiple, other_elems, budget_elems=_BLOCK_BUDGET_ELEMS):
    """Largest divisor of `extent` (multiple of `multiple`) keeping tile*other under
    budget; falls back to the full extent for small shapes / awkward divisors."""
    max_tile = budget_elems // max(other_elems, 1)
    if extent <= max_tile:
        return extent
    t = (min(max_tile, extent) // multiple) * multiple
    while t >= multiple:
        if extent % t == 0:
            return t
        t -= multiple
    return extent


def _prefix_sum(stats, axis):
    """Inclusive prefix sum along `axis` of a small 2-D stats array.

    Hillis-Steele scan: log2(n) zero-pad-shift + add steps (equivalent to
    pltpu.roll + masked add) — O(n log n) work on the tiny per-step stats instead of
    building an O(n^2) triangular mask + matmul every grid step."""
    n = stats.shape[axis]
    shift = 1
    while shift < n:
        if axis == 0:
            pad = jnp.zeros((shift, stats.shape[1]), stats.dtype)
            shifted = jnp.concatenate([pad, stats[: n - shift, :]], axis=0)
        else:
            pad = jnp.zeros((stats.shape[0], shift), stats.dtype)
            shifted = jnp.concatenate([pad, stats[:, : n - shift]], axis=1)
        stats = stats + shifted
        shift *= 2
    return stats


# ----------------------------------------------------------------------------
# Cumulative layer norm kernels (mask-free scan + carried state across T tiles)
# ----------------------------------------------------------------------------
def _cln_1d_kernel(x_ref, g_ref, b_ref, o_ref, carry_ref, *, count_per_step, eps):
    """x block (1, C, Tt): stats over C per step, cumulative over T (lane scan)."""
    t = pl.program_id(1)

    @pl.when(t == 0)
    def _():
        carry_ref[...] = jnp.zeros_like(carry_ref)

    x = x_ref[0].astype(jnp.float32)                               # (C, Tt)
    tt = x.shape[1]
    s = jnp.sum(x, axis=0, keepdims=True)                          # (1, Tt)
    sq = jnp.sum(x * x, axis=0, keepdims=True)                     # (1, Tt)
    stats = _prefix_sum(jnp.concatenate([s, sq], axis=0), axis=1)  # (2, Tt) fused scan
    stats = stats + carry_ref[...]                                 # + running totals
    carry_ref[...] = stats[:, tt - 1:tt]

    cum_sum, cum_pow = stats[0:1, :], stats[1:2, :]
    pos = lax.broadcasted_iota(jnp.int32, (1, tt), 1) + 1 + t * tt
    rcnt = 1.0 / (pos.astype(jnp.float32) * count_per_step)
    mean = cum_sum * rcnt
    var = jnp.maximum((cum_pow - 2.0 * mean * cum_sum) * rcnt + mean * mean, 0.0)
    inv = lax.rsqrt(var + eps)                                     # EUP, stats-sized
    y = (x - mean) * inv
    o_ref[0] = (y * g_ref[...] + b_ref[...]).astype(o_ref.dtype)   # g,b: (C, 1)


def _cln_2d_kernel(x_ref, g_ref, b_ref, o_ref, carry_ref, *, count_per_step, eps):
    """x block (1, C, Tt, F) native layout: stats over (C,F), cumulative over T."""
    t = pl.program_id(1)

    @pl.when(t == 0)
    def _():
        carry_ref[...] = jnp.zeros_like(carry_ref)

    x = x_ref[0].astype(jnp.float32)                               # (C, Tt, F)
    tt = x.shape[1]
    s = jnp.sum(jnp.sum(x, axis=0), axis=1, keepdims=True)         # (Tt, 1)
    sq = jnp.sum(jnp.sum(x * x, axis=0), axis=1, keepdims=True)    # (Tt, 1)
    stats = _prefix_sum(jnp.concatenate([s, sq], axis=1), axis=0)  # (Tt, 2) fused scan
    stats = stats + carry_ref[...]                                 # (Tt,2)+(1,2)
    carry_ref[...] = stats[tt - 1:tt, :]

    cum_sum, cum_pow = stats[:, 0:1], stats[:, 1:2]                # (Tt, 1)
    pos = lax.broadcasted_iota(jnp.int32, (tt, 1), 0) + 1 + t * tt
    rcnt = 1.0 / (pos.astype(jnp.float32) * count_per_step)
    mean = cum_sum * rcnt
    var = jnp.maximum((cum_pow - 2.0 * mean * cum_sum) * rcnt + mean * mean, 0.0)
    inv = lax.rsqrt(var + eps)
    y = (x - mean) * inv                                           # (Tt,1) bcasts
    o_ref[0] = (y * g_ref[...] + b_ref[...]).astype(o_ref.dtype)   # g,b: (C, 1, 1)


# ----------------------------------------------------------------------------
# Instant layer norm kernels (one-pass stats, rsqrt on stats, time-tiled)
# ----------------------------------------------------------------------------
def _iln_1d_kernel(x_ref, g_ref, b_ref, o_ref, *, eps):
    x = x_ref[0].astype(jnp.float32)                               # (C, Tt)
    c = x.shape[0]
    s = jnp.sum(x, axis=0, keepdims=True)                          # (1, Tt)
    sq = jnp.sum(x * x, axis=0, keepdims=True)
    mean = s * (1.0 / c)
    # unbiased variance (torch.var default); guard the C==1 degenerate case
    var = jnp.maximum((sq - s * mean) * (1.0 / max(c - 1, 1)), 0.0)
    inv = lax.rsqrt(var + eps)
    y = (x - mean) * inv
    o_ref[0] = (y * g_ref[...] + b_ref[...]).astype(o_ref.dtype)   # g,b: (C, 1)


def _iln_2d_kernel(x_ref, g_ref, b_ref, o_ref, *, eps):
    x = x_ref[0].astype(jnp.float32)                               # (C, Tt, F)
    n = x.shape[0] * x.shape[2]
    s = jnp.sum(jnp.sum(x, axis=0), axis=1, keepdims=True)         # (Tt, 1)
    sq = jnp.sum(jnp.sum(x * x, axis=0), axis=1, keepdims=True)
    mean = s * (1.0 / n)
    var = jnp.maximum((sq - s * mean) * (1.0 / max(n - 1, 1)), 0.0)
    # 2D module quirk: denominator is sqrt(std + eps), std = sqrt(unbiased var)
    inv = lax.rsqrt(jnp.sqrt(var) + eps)
    y = (x - mean) * inv
    o_ref[0] = (y * g_ref[...] + b_ref[...]).astype(o_ref.dtype)   # g,b: (C, 1, 1)


# ----------------------------------------------------------------------------
# BatchNorm / InstanceNorm: tiled two-pass (resident sum/sumsq accumulator)
# ----------------------------------------------------------------------------
def _moment_stats_kernel(x_ref, s_ref, *, per_sample):
    """Pass 1: accumulate per-channel sum & sum-of-squares into a resident f32 block."""
    b = pl.program_id(0)
    t = pl.program_id(1)
    init = (t == 0) if per_sample else jnp.logical_and(b == 0, t == 0)

    @pl.when(init)
    def _():
        s_ref[...] = jnp.zeros_like(s_ref)

    x = x_ref[0].astype(jnp.float32)
    if x.ndim == 2:                                                # (C, Tt)
        s = jnp.sum(x, axis=1, keepdims=True)                      # (C, 1)
        sq = jnp.sum(x * x, axis=1, keepdims=True)
        s_ref[0] += jnp.concatenate([s, sq], axis=1)               # block (1, C, 2)
    else:                                                          # (C, Tt, F)
        s = jnp.sum(jnp.sum(x, axis=2, keepdims=True), axis=1, keepdims=True)
        sq = jnp.sum(jnp.sum(x * x, axis=2, keepdims=True), axis=1, keepdims=True)
        s_ref[0] += jnp.concatenate([s, sq], axis=2)               # block (1, C, 1, 2)


def _moment_apply_kernel(x_ref, s_ref, g_ref, b_ref, o_ref, *, inv_n, eps):
    """Pass 2: tile-by-tile normalize + affine (biased variance, per torch BN/IN)."""
    x = x_ref[0].astype(jnp.float32)
    st = s_ref[0]                                                  # (C,2) or (C,1,2)
    mean = st[..., 0:1] * inv_n
    var = jnp.maximum(st[..., 1:2] * inv_n - mean * mean, 0.0)
    inv = lax.rsqrt(var + eps)
    scale = inv * g_ref[...]
    shift = b_ref[...] - mean * scale
    o_ref[0] = (x * scale + shift).astype(o_ref.dtype)


# ----------------------------------------------------------------------------
# NormSwitch forward
# ----------------------------------------------------------------------------
def norm_switch(x, gamma, beta, *, norm_type, format, num_features,
                affine=True, eps=1e-5):
    """Forward of NormSwitch.

    x:     '1D' -> (B, C, T);  '2D' -> (B, C, T, F), both kept in their native layout.
    gamma: (C,) per-channel gain; beta: (C,) per-channel bias.
    """
    C = num_features
    assert x.shape[1] == C == gamma.shape[0] == beta.shape[0]
    is_2d = (format == "2D")

    if norm_type in ("cLN", "cIN", "iLN"):
        if norm_type == "cIN" and not is_2d:
            raise ValueError("cIN is only defined for 2D format in NormSwitch")
        if not affine:
            gamma = jnp.ones((C,), x.dtype)
            beta = jnp.zeros((C,), x.dtype)
        if not is_2d:
            B, _, T = x.shape
            tt = _pick_tile(T, 128, C)                      # lane axis: x128 or full
            grid = (B, T // tt)
            x_spec = pl.BlockSpec((1, C, tt), lambda b, t: (b, 0, t))
            p_spec = pl.BlockSpec((C, 1), lambda b, t: (0, 0))
            g2 = gamma.reshape(C, 1).astype(x.dtype)
            b2 = beta.reshape(C, 1).astype(x.dtype)
            if norm_type == "iLN":
                kern = functools.partial(_iln_1d_kernel, eps=eps)
                scratch, dims = [], ("parallel", "parallel")
            else:
                kern = functools.partial(_cln_1d_kernel,
                                         count_per_step=float(C), eps=eps)
                scratch = [pltpu.VMEM((2, 1), jnp.float32)]     # cum carry
                dims = ("parallel", "arbitrary")
        else:
            B, _, T, F = x.shape
            tt = _pick_tile(T, 8, C * F)                    # sublane axis: x8 or full
            grid = (B, T // tt)
            x_spec = pl.BlockSpec((1, C, tt, F), lambda b, t: (b, 0, t, 0))
            p_spec = pl.BlockSpec((C, 1, 1), lambda b, t: (0, 0, 0))
            g2 = gamma.reshape(C, 1, 1).astype(x.dtype)
            b2 = beta.reshape(C, 1, 1).astype(x.dtype)
            if norm_type == "iLN":
                kern = functools.partial(_iln_2d_kernel, eps=eps)
                scratch, dims = [], ("parallel", "parallel")
            else:  # cLN / cIN
                kern = functools.partial(_cln_2d_kernel,
                                         count_per_step=float(C * F), eps=eps)
                scratch = [pltpu.VMEM((1, 2), jnp.float32)]     # cum carry
                dims = ("parallel", "arbitrary")
        return pl.pallas_call(
            kern,
            out_shape=jax.ShapeDtypeStruct(x.shape, x.dtype),
            grid_spec=pltpu.PrefetchScalarGridSpec(
                num_scalar_prefetch=0,
                grid=grid,
                in_specs=[x_spec, p_spec, p_spec],
                out_specs=x_spec,
                scratch_shapes=scratch),
            compiler_params=pltpu.CompilerParams(
                dimension_semantics=dims, vmem_limit_bytes=_VMEM_LIMIT),
        )(x, g2, b2)

    elif norm_type in ("BN", "IN"):
        per_sample = norm_type == "IN"
        if per_sample:
            # nn.InstanceNorm*(num_features, affine): `affine` lands in the eps slot.
            eps_eff = float(affine)
            g_vec = jnp.ones((C,), x.dtype)
            b_vec = jnp.zeros((C,), x.dtype)
        else:
            eps_eff = eps                                    # BN is always affine=True
            g_vec = gamma.astype(x.dtype)
            b_vec = beta.astype(x.dtype)

        if not is_2d:
            B, _, T = x.shape
            tt = _pick_tile(T, 128, C)
            grid = (B, T // tt)
            x_spec = pl.BlockSpec((1, C, tt), lambda b, t: (b, 0, t))
            p_shape = (C, 1)
            p_spec = pl.BlockSpec(p_shape, lambda b, t: (0, 0))
            stats_shape = (B if per_sample else 1, C, 2)
            stats_spec = pl.BlockSpec(
                (1, C, 2),
                (lambda b, t: (b, 0, 0)) if per_sample else (lambda b, t: (0, 0, 0)))
            n_red = T * (1 if per_sample else B)
        else:
            B, _, T, F = x.shape
            tt = _pick_tile(T, 8, C * F)
            grid = (B, T // tt)
            x_spec = pl.BlockSpec((1, C, tt, F), lambda b, t: (b, 0, t, 0))
            p_shape = (C, 1, 1)
            p_spec = pl.BlockSpec(p_shape, lambda b, t: (0, 0, 0))
            stats_shape = (B if per_sample else 1, C, 1, 2)
            stats_spec = pl.BlockSpec(
                (1, C, 1, 2),
                (lambda b, t: (b, 0, 0, 0)) if per_sample else (lambda b, t: (0, 0, 0, 0)))
            n_red = T * F * (1 if per_sample else B)

        # Pass 1: per-channel sum / sumsq accumulated in a resident f32 block.
        stats = pl.pallas_call(
            functools.partial(_moment_stats_kernel, per_sample=per_sample),
            out_shape=jax.ShapeDtypeStruct(stats_shape, jnp.float32),
            grid_spec=pltpu.PrefetchScalarGridSpec(
                num_scalar_prefetch=0, grid=grid,
                in_specs=[x_spec], out_specs=stats_spec),
            compiler_params=pltpu.CompilerParams(
                dimension_semantics=("arbitrary", "arbitrary"),
                vmem_limit_bytes=_VMEM_LIMIT),
        )(x)

        # Pass 2: tile-by-tile normalize + affine, fully parallel over (B, T tiles).
        g2 = g_vec.reshape(p_shape)
        b2 = b_vec.reshape(p_shape)
        return pl.pallas_call(
            functools.partial(_moment_apply_kernel, inv_n=1.0 / n_red, eps=eps_eff),
            out_shape=jax.ShapeDtypeStruct(x.shape, x.dtype),
            grid_spec=pltpu.PrefetchScalarGridSpec(
                num_scalar_prefetch=0, grid=grid,
                in_specs=[x_spec, stats_spec, p_spec, p_spec],
                out_specs=x_spec),
            compiler_params=pltpu.CompilerParams(
                dimension_semantics=("parallel", "parallel"),
                vmem_limit_bytes=_VMEM_LIMIT),
        )(x, stats, g2, b2)

    else:
        raise ValueError(f"unknown norm_type {norm_type!r}")


# ----------------------------------------------------------------------------
# Pure-JAX references (mirror the PyTorch math) — verification only
# ----------------------------------------------------------------------------
def _ref_cln1d(x, g, b, eps=1e-5):
    _, C, T = x.shape
    cum_sum = jnp.cumsum(jnp.sum(x, axis=1), axis=-1)
    cum_pow = jnp.cumsum(jnp.sum(x * x, axis=1), axis=-1)
    cnt = jnp.arange(1, T + 1, dtype=x.dtype) * C
    mean = cum_sum / cnt
    var = (cum_pow - 2 * mean * cum_sum) / cnt + mean ** 2
    std = jnp.sqrt(var + eps)
    xn = (x - mean[:, None, :]) / std[:, None, :]
    return xn * g.reshape(1, C, 1) + b.reshape(1, C, 1)


def _ref_cln2d(x, g, b, eps=1e-5):
    _, C, T, F = x.shape
    cum_sum = jnp.cumsum(jnp.sum(x, axis=(1, 3)), axis=-1)
    cum_pow = jnp.cumsum(jnp.sum(x * x, axis=(1, 3)), axis=-1)
    cnt = jnp.arange(1, T + 1, dtype=x.dtype) * (C * F)
    mean = cum_sum / cnt
    var = (cum_pow - 2 * mean * cum_sum) / cnt + mean ** 2
    std = jnp.sqrt(var + eps)
    xn = (x - mean[:, None, :, None]) / std[:, None, :, None]
    return xn * g.reshape(1, C, 1, 1) + b.reshape(1, C, 1, 1)


def _ref_iln1d(x, g, b, eps=1e-5):
    C = x.shape[1]
    mean = jnp.mean(x, axis=1, keepdims=True)
    var = jnp.var(x, axis=1, keepdims=True, ddof=1)
    xn = (x - mean) / jnp.sqrt(var + eps)
    return xn * g.reshape(1, C, 1) + b.reshape(1, C, 1)


def _ref_iln2d(x, g, b, eps=1e-5):
    C = x.shape[1]
    mean = jnp.mean(x, axis=(1, 3), keepdims=True)
    std = jnp.sqrt(jnp.var(x, axis=(1, 3), keepdims=True, ddof=1))
    xn = (x - mean) / jnp.sqrt(std + eps)
    return xn * g.reshape(1, C, 1, 1) + b.reshape(1, C, 1, 1)


def _ref_bn(x, g, b, eps=1e-5):
    axes = (0,) + tuple(range(2, x.ndim))
    mean = jnp.mean(x, axis=axes, keepdims=True)
    var = jnp.mean((x - mean) ** 2, axis=axes, keepdims=True)
    shape = (1, x.shape[1]) + (1,) * (x.ndim - 2)
    return (x - mean) / jnp.sqrt(var + eps) * g.reshape(shape) + b.reshape(shape)


def _ref_in(x, eps):
    axes = tuple(range(2, x.ndim))
    mean = jnp.mean(x, axis=axes, keepdims=True)
    var = jnp.mean((x - mean) ** 2, axis=axes, keepdims=True)
    return (x - mean) / jnp.sqrt(var + eps)


# ----------------------------------------------------------------------------
if __name__ == "__main__":
    key = jax.random.PRNGKey(0)
    kx1, kx2, kg, kb = jax.random.split(key, 4)

    B, C, T, F = 2, 4, 16, 16
    x1d = jax.random.normal(kx1, (B, C, T), dtype=jnp.float32)
    x2d = jax.random.normal(kx2, (B, C, T, F), dtype=jnp.float32)
    gamma = 1.0 + 0.1 * jax.random.normal(kg, (C,), dtype=jnp.float32)
    beta = 0.1 * jax.random.normal(kb, (C,), dtype=jnp.float32)

    def run(norm_type, fmt, x, ref):
        fwd = jax.jit(functools.partial(
            norm_switch, norm_type=norm_type, format=fmt, num_features=C))
        out = jax.block_until_ready(fwd(x, gamma, beta))
        assert out.shape == ref.shape, (norm_type, fmt, out.shape, ref.shape)
        err = float(jnp.max(jnp.abs(out - ref)))
        assert bool(jnp.allclose(out, ref, atol=2e-4, rtol=2e-4)), (norm_type, fmt, err)

    run("cLN", "1D", x1d, _ref_cln1d(x1d, gamma, beta))
    run("cLN", "2D", x2d, _ref_cln2d(x2d, gamma, beta))
    run("cIN", "2D", x2d, _ref_cln2d(x2d, gamma, beta))
    run("iLN", "1D", x1d, _ref_iln1d(x1d, gamma, beta))
    run("iLN", "2D", x2d, _ref_iln2d(x2d, gamma, beta))
    run("BN", "1D", x1d, _ref_bn(x1d, gamma, beta))
    run("BN", "2D", x2d, _ref_bn(x2d, gamma, beta))
    run("IN", "1D", x1d, _ref_in(x1d, eps=1.0))   # affine arg lands in eps slot (quirk)
    run("IN", "2D", x2d, _ref_in(x2d, eps=1.0))

    print("KERNEL_OK")
</pallas_src>

<mosaic_0001>
module attributes {stable_mosaic.version = 11 : i64} {
  func.func @_cln_1d_kernel(%arg0: i32, %arg1: i32, %arg2: memref<1x4x16xf32, #tpu.memory_space<vmem>>, %arg3: memref<4x1xf32, #tpu.memory_space<vmem>>, %arg4: memref<4x1xf32, #tpu.memory_space<vmem>>, %arg5: memref<1x4x16xf32, #tpu.memory_space<vmem>>, %arg6: memref<2x1xf32, #tpu.memory_space<vmem>>) attributes {dimension_semantics = [#tpu.dimension_semantics<parallel>, #tpu.dimension_semantics<arbitrary>], iteration_bounds = array<i64: 2, 1>, scalar_prefetch = 0 : i64, scratch_operands = 1 : i64, tpu.core_type = #tpu.core_type<tc>, window_params = [{transform_indices = @transform_0, window_bounds = array<i64: 1, 4, 16>}, {pipeline_mode = #tpu.pipeline_mode<synchronous>, transform_indices = @transform_1, window_bounds = array<i64: 4, 1>}, {pipeline_mode = #tpu.pipeline_mode<synchronous>, transform_indices = @transform_2, window_bounds = array<i64: 4, 1>}, {transform_indices = @transform_3, window_bounds = array<i64: 1, 4, 16>}]} {
    %c0_i32 = arith.constant 0 : i32
    %0 = arith.cmpi eq, %arg1, %c0_i32 : i32
    %1 = arith.extui %0 : i1 to i32
    %c0_i32_0 = arith.constant 0 : i32
    %2 = arith.cmpi ne, %1, %c0_i32_0 : i32
    scf.if %2 {
      %cst_24 = arith.constant 0.000000e+00 : f32
      %71 = vector.broadcast %cst_24 : f32 to vector<2x1xf32>
      %c0_25 = arith.constant 0 : index
      %c0_26 = arith.constant 0 : index
      %72 = vector.load %arg6[%c0_25, %c0_26] : memref<2x1xf32, #tpu.memory_space<vmem>>, vector<2x1xf32>
      tpu.vector_store %arg6[%c0_25, %c0_26], %71 {strides = array<i32>} : memref<2x1xf32, #tpu.memory_space<vmem>>, vector<2x1xf32>,
    } else {
    }
    %c0 = arith.constant 0 : index
    %c0_1 = arith.constant 0 : index
    %c0_2 = arith.constant 0 : index
    %3 = vector.load %arg2[%c0, %c0_1, %c0_2] : memref<1x4x16xf32, #tpu.memory_space<vmem>>, vector<1x4x16xf32>
    %4 = vector.shape_cast %3 : vector<1x4x16xf32> to vector<4x16xf32>
    %cst = arith.constant dense<0.000000e+00> : vector<16xf32>
    %5 = vector.multi_reduction <add>, %4, %cst [0] : vector<4x16xf32> to vector<16xf32>
    %6 = vector.shape_cast %5 : vector<16xf32> to vector<1x16xf32>
    %7 = arith.mulf %4, %4 : vector<4x16xf32>
    %cst_3 = arith.constant dense<0.000000e+00> : vector<16xf32>
    %8 = vector.multi_reduction <add>, %7, %cst_3 [0] : vector<4x16xf32> to vector<16xf32>
    %9 = vector.shape_cast %8 : vector<16xf32> to vector<1x16xf32>
    %10 = tpu.concatenate %6, %9 in 0 : vector<1x16xf32>, vector<1x16xf32> -> vector<2x16xf32>
    %cst_4 = arith.constant 0.000000e+00 : f32
    %11 = vector.broadcast %cst_4 : f32 to vector<2x1xf32>
    %12 = vector.extract_strided_slice %10 {offsets = [0, 0], sizes = [2, 15], strides = [1, 1]} : vector<2x16xf32> to vector<2x15xf32>
    %13 = tpu.concatenate %11, %12 in 1 : vector<2x1xf32>, vector<2x15xf32> -> vector<2x16xf32>
    %14 = arith.addf %10, %13 : vector<2x16xf32>
    %cst_5 = arith.constant 0.000000e+00 : f32
    %15 = vector.broadcast %cst_5 : f32 to vector<2x2xf32>
    %16 = vector.extract_strided_slice %14 {offsets = [0, 0], sizes = [2, 14], strides = [1, 1]} : vector<2x16xf32> to vector<2x14xf32>
    %17 = tpu.concatenate %15, %16 in 1 : vector<2x2xf32>, vector<2x14xf32> -> vector<2x16xf32>
    %18 = arith.addf %14, %17 : vector<2x16xf32>
    %cst_6 = arith.constant 0.000000e+00 : f32
    %19 = vector.broadcast %cst_6 : f32 to vector<2x4xf32>
    %20 = vector.extract_strided_slice %18 {offsets = [0, 0], sizes = [2, 12], strides = [1, 1]} : vector<2x16xf32> to vector<2x12xf32>
    %21 = tpu.concatenate %19, %20 in 1 : vector<2x4xf32>, vector<2x12xf32> -> vector<2x16xf32>
    %22 = arith.addf %18, %21 : vector<2x16xf32>
    %cst_7 = arith.constant 0.000000e+00 : f32
    %23 = vector.broadcast %cst_7 : f32 to vector<2x8xf32>
    %24 = vector.extract_strided_slice %22 {offsets = [0, 0], sizes = [2, 8], strides = [1, 1]} : vector<2x16xf32> to vector<2x8xf32>
    %25 = tpu.concatenate %23, %24 in 1 : vector<2x8xf32>, vector<2x8xf32> -> vector<2x16xf32>
    %26 = arith.addf %22, %25 : vector<2x16xf32>
    %c0_8 = arith.constant 0 : index
    %c0_9 = arith.constant 0 : index
    %27 = vector.load %arg6[%c0_8, %c0_9] : memref<2x1xf32, #tpu.memory_space<vmem>>, vector<2x1xf32>
    %28 = vector.broadcast %27 : vector<2x1xf32> to vector<2x16xf32>
    %29 = arith.addf %26, %28 : vector<2x16xf32>
    %30 = vector.extract_strided_slice %29 {offsets = [0, 15], sizes = [2, 1], strides = [1, 1]} : vector<2x16xf32> to vector<2x1xf32>
    %c0_10 = arith.constant 0 : index
    %c0_11 = arith.constant 0 : index
    %31 = vector.load %arg6[%c0_10, %c0_11] : memref<2x1xf32, #tpu.memory_space<vmem>>, vector<2x1xf32>
    tpu.vector_store %arg6[%c0_10, %c0_11], %30 {strides = array<i32>} : memref<2x1xf32, #tpu.memory_space<vmem>>, vector<2x1xf32>,
    %32 = vector.extract_strided_slice %29 {offsets = [0, 0], sizes = [1, 16], strides = [1, 1]} : vector<2x16xf32> to vector<1x16xf32>
    %33 = vector.extract_strided_slice %29 {offsets = [1, 0], sizes = [1, 16], strides = [1, 1]} : vector<2x16xf32> to vector<1x16xf32>
    %34 = tpu.iota {dimensions = array<i32: 1>} : vector<1x16xi32>
    %c1_i32 = arith.constant 1 : i32
    %35 = vector.broadcast %c1_i32 : i32 to vector<1x16xi32>
    %36 = arith.addi %34, %35 : vector<1x16xi32>
    %c16_i32 = arith.constant 16 : i32
    %37 = arith.muli %arg1, %c16_i32 : i32
    %38 = vector.broadcast %37 : i32 to vector<1x16xi32>
    %39 = arith.addi %36, %38 : vector<1x16xi32>
    %40 = arith.sitofp %39 : vector<1x16xi32> to vector<1x16xf32>
    %cst_12 = arith.constant 4.000000e+00 : f32
    %41 = vector.broadcast %cst_12 : f32 to vector<1x16xf32>
    %42 = arith.mulf %40, %41 : vector<1x16xf32>
    %cst_13 = arith.constant 1.000000e+00 : f32
    %43 = vector.broadcast %cst_13 : f32 to vector<1x16xf32>
    %44 = arith.divf %43, %42 : vector<1x16xf32>
    %45 = arith.mulf %32, %44 : vector<1x16xf32>
    %cst_14 = arith.constant 2.000000e+00 : f32
    %46 = vector.broadcast %cst_14 : f32 to vector<1x16xf32>
    %47 = arith.mulf %46, %45 : vector<1x16xf32>
    %48 = arith.mulf %47, %32 : vector<1x16xf32>
    %49 = arith.subf %33, %48 : vector<1x16xf32>
    %50 = arith.mulf %49, %44 : vector<1x16xf32>
    %51 = arith.mulf %45, %45 : vector<1x16xf32>
    %52 = arith.addf %50, %51 : vector<1x16xf32>
    %cst_15 = arith.constant 0.000000e+00 : f32
    %53 = vector.broadcast %cst_15 : f32 to vector<1x16xf32>
    %54 = arith.maximumf %52, %53 : vector<1x16xf32>
    %cst_16 = arith.constant 9.99999974E-6 : f32
    %55 = vector.broadcast %cst_16 : f32 to vector<1x16xf32>
    %56 = arith.addf %54, %55 : vector<1x16xf32>
    %57 = math.rsqrt %56 : vector<1x16xf32>
    %58 = vector.broadcast %45 : vector<1x16xf32> to vector<4x16xf32>
    %59 = arith.subf %4, %58 : vector<4x16xf32>
    %60 = vector.broadcast %57 : vector<1x16xf32> to vector<4x16xf32>
    %61 = arith.mulf %59, %60 : vector<4x16xf32>
    %c0_17 = arith.constant 0 : index
    %c0_18 = arith.constant 0 : index
    %62 = vector.load %arg3[%c0_17, %c0_18] : memref<4x1xf32, #tpu.memory_space<vmem>>, vector<4x1xf32>
    %63 = vector.broadcast %62 : vector<4x1xf32> to vector<4x16xf32>
    %64 = arith.mulf %61, %63 : vector<4x16xf32>
    %c0_19 = arith.constant 0 : index
    %c0_20 = arith.constant 0 : index
    %65 = vector.load %arg4[%c0_19, %c0_20] : memref<4x1xf32, #tpu.memory_space<vmem>>, vector<4x1xf32>
    %66 = vector.broadcast %65 : vector<4x1xf32> to vector<4x16xf32>
    %67 = arith.addf %64, %66 : vector<4x16xf32>
    %c0_21 = arith.constant 0 : index
    %c0_22 = arith.constant 0 : index
    %c0_23 = arith.constant 0 : index
    %68 = vector.load %arg5[%c0_21, %c0_22, %c0_23] : memref<1x4x16xf32, #tpu.memory_space<vmem>>, vector<1x4x16xf32>
    %69 = vector.shape_cast %68 : vector<1x4x16xf32> to vector<4x16xf32>
    %70 = vector.shape_cast %67 : vector<4x16xf32> to vector<1x4x16xf32>
    tpu.vector_store %arg5[%c0_21, %c0_22, %c0_23], %70 {strides = array<i32>} : memref<1x4x16xf32, #tpu.memory_space<vmem>>, vector<1x4x16xf32>,
    return
  }
  func.func @transform_0(%arg0: i32, %arg1: i32) -> (i32, i32, i32) {
    %c0_i32 = arith.constant 0 : i32
    %c0_i32_0 = arith.constant 0 : i32
    return %arg0, %c0_i32, %arg1 : i32, i32, i32
  }
  func.func @transform_1(%arg0: i32, %arg1: i32) -> (i32, i32) {
    %c0_i32 = arith.constant 0 : i32
    %c0_i32_0 = arith.constant 0 : i32
    %c0_i32_1 = arith.constant 0 : i32
    return %c0_i32, %c0_i32_0 : i32, i32
  }
  func.func @transform_2(%arg0: i32, %arg1: i32) -> (i32, i32) {
    %c0_i32 = arith.constant 0 : i32
    %c0_i32_0 = arith.constant 0 : i32
    %c0_i32_1 = arith.constant 0 : i32
    return %c0_i32, %c0_i32_0 : i32, i32
  }
  func.func @transform_3(%arg0: i32, %arg1: i32) -> (i32, i32, i32) {
    %c0_i32 = arith.constant 0 : i32
    %c0_i32_0 = arith.constant 0 : i32
    return %arg0, %c0_i32, %arg1 : i32, i32, i32
  }
}

</mosaic_0001>

<bundles_post_ra>
// kernel: norm_switch.1
= control target key start
LH: loop header
LB: loop body
LE: loop exit
PB: predicated region body
PF: predicated region fallthrough
CT: control target
= control target key end

     0   :  { %8 = vsyncpa [#allocation4], 0  ;;  %s710_s0 = inlined_call_operand.vmem [shape: f32[2,4,16], index: 0, kind: input, shape index: {}]   ;;  %s711_s1 = inlined_call_operand.vmem [shape: f32[4,1], index: 1, kind: input, shape index: {}]   ;;  %s712_s2 = inlined_call_operand.vmem [shape: f32[4,1], index: 2, kind: input, shape index: {}]   ;;  %s713_s3 = inlined_call_operand.hbm [shape: f32[2,4,16], index: 3, kind: output, shape index: {}]  }
   0x1   :  { %10 = vsyncpa [#allocation4 + $0x1], 0  ;;  %s581_s12 = smov 0   ;;  %s583_s13 = smov 0  }
   0x2   :  { %s585_s14 = smov 0   ;;  %s587_s15 = smov 0  }
   0x3   :  { %s589_s16 = smov 0   ;;  %s591_s17 = smov 0  }
   0x4 LB: > { %s394_s18 = sadd.s32 4294967295, %s551_s17   ;;  %s395_s19 = sadd.s32 4294967294, %s551_s17   ;;  %s551_s17 = sphi %s591_s17, %s16_s17   ;;  %s547_s16 = sphi %s589_s16, %s720_s16   ;;  %s543_s15 = sphi %s587_s15, %s719_s15   ;;  %s539_s14 = sphi %s585_s14, %s718_s14   ;;  %s535_s13 = sphi %s583_s13, %s717_s13   ;;  %s531_s12 = sphi %s581_s12, %s716_s12  }
   0x5   : > { %s28_s20 = sadd.s32 1, %s547_s16  ;;  %s107_s21 = sadd.s32 1, %s539_s14 }
   0x6   : > { %p30_p0 = scmp.ge.s32.totalorder %s28_s20, 2  ;;  %p117_p1 = scmp.ne.s32.totalorder %s539_s14, %s535_s13 }
   0x7   : > { %p118_p2 = scmp.eq.s32.totalorder %s394_s18, 1  ;;  %p123_p3 = scmp.ne.s32.totalorder %s535_s13, %s531_s12 }
   0x8   : > { %s722_s20 = smov (%p30_p0, %s28_s20), 0  ;;  %p124_p5 = scmp.eq.s32.totalorder %s395_s19, 1 }
   0x9   : > { %p621_p4 = por %p118_p2, %p117_p1  ;;  %s102_s23 = ssub.s32 %s547_s16, %s722_s20 }
   0xa   : > { %p398_p6 = scmp.ge.s32.totalorder %s551_s17, 1  ;;  %p105_p7 = scmp.eq.s32.totalorder %s102_s23, 0 }
   0xb   : > { %p628_p8 = por %p124_p5, %p123_p3  ;;  %p158_p9 = scmp.lt.s32.totalorder %s551_s17, 3 }
   0xc   : > { %s634_s25 = scalar_select %p105_p7, %s539_s14, %s107_s21  }
   0xd   : > { %p159_p10 = pnand %p398_p6, %p158_p9 }
   0xe   : > { %p184_p11 = scmp.lt.s32.totalorder (!%p159_p10), %s543_s15, 1  ;;  %vm198_vm0 = vcmask (!%p159_p10), 125952   ;;  %vm214_vm1 = vcmask (!%p159_p10), 1040384   ;;  %s553_s4 = smov (!%p159_p10), 1   ;;  %vm195_vm2 = vcmask (!%p159_p10), 1024   ;;  %v554_v17 = vmov (!%p159_p10), 0  }
   0xf   : > { %162 = sbr.rel (%p159_p10) target bundleno = 633 (0x279), region = 32  ;;  %467 = vset.pattern.permute.xlu1 (!%p159_p10), %v554_v17  ;;  %v555_v18 = vmov (!%p159_p10), 0.0   ;;  %468 = vset.pattern.permute.xlu0 (!%p159_p10), %v554_v17  ;;  %vm220_vm3 = vcmask (!%p159_p10), 7168   ;;  %s556_s5 = smov (!%p159_p10), 2   ;;  %vm227_vm4 = vcmask (!%p159_p10), 15360   ;;  %vm234_vm5 = vcmask (!%p159_p10), 31744  }
  0x10   : > { %196 = vst.msk [vmem:[#allocation2] sm:$0x3] (!%p159_p10), %vm195_vm2, %v555_v18  ;;  %s557_s6 = smov (!%p159_p10), 4   ;;  %v293_v26 = vld [vmem:[%s711_s1] sm:$0xf] (!%p159_p10)  ;;  %s558_s9 = smov (!%p159_p10), 8   ;;  %v257_v31 = vlaneseq (!%p159_p10) }
  0x11   : > { %v300_v30 = vld [vmem:[%s712_s2] sm:$0xf] (!%p159_p10)  ;;  %vm241_vm6 = vcmask (!%p159_p10), 64512   ;;  %s559_s18 = smov (!%p159_p10), 113   ;;  %s181_s19 = sand.u32 (!%p159_p10), 1, %s535_s13  }
  0x12   : > { %v258_v32 = vand.u32 (!%p159_p10), 127, %v257_v31  ;;  %v284_v53 = vshrl.u32 (!%p159_p10), %v257_v31, 7  ;;  %s399_s21 = sshll.u32 (!%p159_p10), %s181_s19, 2  ;;  %s402_s23 = sshll.u32 (!%p159_p10), %s543_s15, 6 }
  0x14   : > { %v259_v33 = vadd.s32 (!%p159_p10), 1, %v258_v32  ;;  %v285_v54 = vsub.s32 (!%p159_p10), 0, %v284_v53  ;;  %v290_v56 = vsub.s32 (!%p159_p10), 1, %v284_v53 }
  0x16   : > { %s185_s26 = scalar_select %p184_p11, %s543_s15, 1  ;;  %v263_v34 = vcvt.s32.f32 %v259_v33 }
  0x17   : > { %v244_v25 = vld [vmem:[#allocation2] sm:$0x3]  ;;  %s560_s15 = smov [#allocation3]  }
  0x18   : > { %s400_s27 = sshll.u32 %s185_s26, 2  ;;  %v264_v35 = vmul.f32 4.0, %v263_v34  ;;  %s183_s26 = scalar_lea.vmem [#allocation3], %s399_s21 }
  0x19   : > { %s190_s30 = scalar_lea.vmem %s710_s0, %s400_s27  ;;  %s323_s27 = sshll.u32 %s183_s26, 4  ;;  %s663_s27 = int_to_ptr.vmem [resolvable:$true] %s323_s27 }
  0x1a   : > { %v641_v0 = vld [vmem:[%s190_s30] sm:$0xf]  ;;  %469 = vrcp.f32 %v264_v35  ;;  %s661_s30 = scalar_lea.hbm %s713_s3, %s402_s23 }
  0x1b   : > { %v199_v1 = vsel %vm198_vm0, %v641_v0, 0.0  ;;  %v206_v2 = vmul.f32 %v641_v0, %v641_v0 }
  0x1c   : > { %v200_v3 = vrot.slane %v199_v1, 4 }
  0x1d   : > { %v207_v4 = vsel %vm198_vm0, %v206_v2, 0.0 }
  0x1e   : > { %v201_v5 = vadd.f32 %v200_v3, %v199_v1  ;;  %v208_v6 = vrot.slane %v207_v4, 4 }
  0x20   : > { %v202_v7 = vrot.slane %v201_v5, 2  ;;  %v209_v8 = vadd.f32 %v208_v6, %v207_v4 }
  0x22   : > { %v203_v9 = vadd.f32 %v202_v7, %v201_v5  ;;  %v210_v10 = vrot.slane %v209_v8, 2 }
  0x24   : > { %v204_v11 = vrot.slane %v203_v9, 1  ;;  %v211_v12 = vadd.f32 %v210_v10, %v209_v8  ;;  %v470_v39 = vpop.eup %469 }
  0x26   : > { %v205_v13 = vadd.f32 %v204_v11, %v203_v9  ;;  %v212_v14 = vrot.slane %v211_v12, 1 }
  0x28   : > { %v213_v15 = vadd.f32 %v212_v14, %v211_v12 }
  0x2a   : > { %v215_v16 = vsel %vm214_vm1, %v205_v13, %v213_v15 }
  0x2b   : > { %217 = vrot.lane.b32.xlu0 %v215_v16, %s553_s4  ;;  %s309_s4 = scalar_lea.sflag [#allocation4], %s181_s19 }
  0x9d   : > { %v218_v19 = vpop.permute.xlu0 %217 }
  0x9e   : > { %v221_v20 = vsel %vm220_vm3, 0.0, %v218_v19 }
  0x9f   : > { %v222_v21 = vadd.f32 %v221_v20, %v215_v16 }
  0xa1   : > { %224 = vrot.lane.b32.xlu0 %v222_v21, %s556_s5  ;;  %s473_s5 = scalar_lea.vmem %s663_s27, 64 }
  0xa2   : > { %p474_p12 = scmp.ne.s32.totalorder %s663_s27, %s473_s5 }
  0xa4   : > { %p475_p13 = pnand %p474_p12, %p621_p4 }
  0xa6   : > { %p476_p0 = pneg %p475_p13 }
 0x113   : > { %v225_v22 = vpop.permute.xlu0 %224 }
 0x114   : > { %v228_v23 = vsel %vm227_vm4, 0.0, %v225_v22 }
 0x115   : > { %v229_v24 = vadd.f32 %v228_v23, %v222_v21 }
 0x117   : > { %231 = vrot.lane.b32.xlu1 %v229_v24, %s557_s6  ;;  %s477_s6 = sshll.u32 %s560_s15, 4  ;;  %s478_s6 = int_to_ptr.vmem [resolvable:$false] %s477_s6 }
 0x118   : > { %s479_s7 = scalar_lea.vmem %s478_s6, 128  ;;  %p480_p1 = scmp.lt.s32.totalorder %s663_s27, %s478_s6 }
 0x119   : > { %p481_p2 = scmp.lt.s32.totalorder %s479_s7, %s473_s5 }
 0x11b   : > { %247 = vperm.xlu1 %467, %v244_v25   ;;  %p482_p3 = por %p481_p2, %p480_p1 }
 0x11d   : > { %p483_p5 = pnand %p482_p3, %p476_p0 }
 0x11f   : > { %296 = vperm.xlu1 %467, %v293_v26  }
 0x189   : > { %v232_v27 = vpop.permute.xlu1 %231 }
 0x18a   : > { %v235_v28 = vsel %vm234_vm5, 0.0, %v232_v27 }
 0x18b   : > { %v236_v29 = vadd.f32 %v235_v28, %v229_v24 }
 0x18d   : > { %238 = vrot.lane.b32.xlu0 %v236_v29, %s558_s9 }
 0x191   : > { %303 = vperm.xlu0 %468, %v300_v30  }
 0x19a   : > { %v248_v40 = vpop.permute.xlu1 %247 }
 0x19e   : > { %v297_v61 = vpop.permute.xlu1 %296 }
 0x1ff   : > { %v239_v36 = vpop.permute.xlu0 %238 }
 0x200   : > { %v242_v37 = vsel %vm241_vm6, 0.0, %v239_v36 }
 0x201   : > { %v243_v38 = vadd.f32 %v242_v37, %v236_v29 }
 0x203   : > { %v250_v41 = vadd.f32 %v248_v40, %v243_v38 }
 0x205   : > { %v267_v42 = vmul.f32 %v470_v39, %v250_v41  ;;  %252 = vrot.lane.b32.xlu1 %v250_v41, %s559_s18 }
 0x207   : > { %v268_v43 = vmul.f32 2.0, %v267_v42  ;;  %v275_v46 = vmul.f32 %v267_v42, %v267_v42  ;;  %v286_v55 = vrot.slane %v267_v42, %v285_v54 }
 0x209   : > { %v269_v44 = vmul.f32 %v268_v43, %v250_v41  ;;  %v277_v49 = vrot.slane %v275_v46, 7  ;;  %v287_v58 = vsub.f32 %v641_v0, %v286_v55 }
 0x20b   : > { %v271_v45 = vrot.slane %v269_v44, 7 }
 0x20d   : > { %v273_v47 = vsub.f32 %v250_v41, %v271_v45 }
 0x20f   : > { %v274_v48 = vmul.f32 %v470_v39, %v273_v47 }
 0x210   : > { %v304_v62 = vpop.permute.xlu0 %303 }
 0x211   : > { %v279_v50 = vadd.f32 %v277_v49, %v274_v48 }
 0x213   : > { %v280_v51 = vmax.f32 %v279_v50, 0.0 }
 0x215   : > { %v281_v52 = vadd.f32 1e-05, %v280_v51 }
 0x217   : > { %471 = vrsqrt.f32 %v281_v52 }
 0x221   : > { %v472_v57 = vpop.eup %471 }
 0x222   : > { %v291_v59 = vrot.slane %v472_v57, %v290_v56 }
 0x224   : > { %v292_v60 = vmul.f32 %v291_v59, %v287_v58 }
 0x226   : > { %v299_v63 = vmul.f32 %v297_v61, %v292_v60 }
 0x228   : > { %v306_v1 = vadd.f32 %v304_v62, %v299_v63 }
 0x22a   : > { %307 = vst.msk [vmem:[%s183_s26] sm:$0xf] %vm198_vm0, %v306_v1 }
 0x22b   : > { %486 = shalt.err (!%p483_p5)
}
 0x22c   : > { %s487_s8 = scalar_lea.hbm %s661_s30, 64  ;;  %s491_s11 = scalar_lea.hbm %s713_s3, 128 }
 0x22d   : > { %p488_p6 = scmp.ne.s32.totalorder %s661_s30, %s487_s8  ;;  %p492_p10 = scmp.lt.u32.totalorder %s661_s30, %s713_s3 }
 0x22e   : > { %p493_p11 = scmp.lt.u32.totalorder %s491_s11, %s487_s8  ;;  %p495_p13 = scmp.lt.u32.totalorder %s487_s8, %s661_s30 }
 0x22f   : > { %p489_p7 = pnand %p488_p6, %p621_p4 }
 0x230   : > { %p494_p12 = por %p493_p11, %p492_p10 }
 0x231   : > { %p490_p9 = pneg %p489_p7 }
 0x232   : > { %p496_p0 = por %p495_p13, %p494_p12 }
 0x234   : > { %p497_p1 = pnand %p496_p0, %p490_p9 }
 0x236   : > { %500 = shalt.err (!%p497_p1)
}
 0x237   : > { %405 = dma.vmem_to_hbm [thread:$0]  (%p621_p4), %s663_s27, 64, %s661_s30, %s309_s4  }
 0x277   : > { %v253_v0 = vpop.permute.xlu1 %252 }
 0x278   : > { %256 = vst.msk [vmem:[#allocation2] sm:$0x3] %vm195_vm2, %v253_v0 }
 0x279 PF: > { %p411_p2 = scmp.ge.s32.totalorder %s551_s17, 2  ;;  %s335_s21 = sand.u32 1, %s531_s12  }
 0x27a   : > { %s336_s23 = scalar_lea.sflag [#allocation4], %s335_s21 }
 0x27b   : > { %p408_p3 = pnand %p411_p2, %p628_p8 }
 0x27d   : > { %526 = dma.done.wait (!%p408_p3), %s336_s23, 64  }
 0x27e   : > { %528 = vsyncadd (!%p408_p3), %s336_s23, 4294967232  ;;  %s16_s17 = sadd.s32 1, %s551_s17   ;;  %s716_s12 = smov %s535_s13 }
 0x27f   : > { %p13_p5 = scmp.ge.s32.totalorder %s16_s17, 4   ;;  %s717_s13 = smov %s539_s14 }
 0x280   : > { %s718_s14 = smov %s634_s25  ;;  %s719_s15 = smov %s547_s16 }
 0x281   : > { %s720_s16 = smov %s722_s20  ;;  %15 = sbr.rel (!%p13_p5) target bundleno = 4 (0x4), region = 71 }
 0x288   :  { %341 = vsyncpa [#allocation4], 1 }
 0x289   :  { %343 = vsyncpa [#allocation4 + $0x1], 1 }

</bundles_post_ra>
